<compile_context>
chip_gen: v5e
topology: v5e:2x2
jax: 0.10.0
libtpu: 0.0.40
codegen_flags: <defaults>
</compile_context>

<pallas_src>
import functools
import math

import jax
import jax.numpy as jnp
from jax.experimental import pallas as pl
from jax.experimental.pallas import tpu as pltpu


NEG_SLOPE = 0.01  # nn.LeakyReLU default negative_slope


# ----------------------------------------------------------------------------
# Kernel
# ----------------------------------------------------------------------------
def _make_ae_kernel(n_enc_layers, n_dec_layers):
    """Kernel over one batch tile.

    Activations are (TB, features) tiles in natural batch-major layout.
    Weights arrive pre-transposed as bf16 (in, out); biases as f32 (1, out).
    Each linear layer is `h_bf16 @ W_bf16` with f32 MXU accumulation, followed
    by an f32 epilogue (LeakyReLU for hidden layers, sigmoid for the MLP tail).
    """

    def _sigmoid(h):
        # exp + approx reciprocal both route to the EUP slot (idle otherwise).
        return pl.reciprocal(1.0 + jnp.exp(-h), approx=True)

    def _linear(h, w_ref, b_ref):
        return (
            jnp.dot(h.astype(jnp.bfloat16), w_ref[...],
                    preferred_element_type=jnp.float32)
            + b_ref[...]  # (1, out) broadcasts over the batch (sublane) axis
        )

    def kernel(x_ref, *refs):
        n_param_refs = 2 * (n_enc_layers + n_dec_layers)
        p_refs = refs[:n_param_refs]
        xrec_ref, z_ref = refs[n_param_refs], refs[n_param_refs + 1]

        h = x_ref[...]  # (TB, n_features), f32

        # ---- encoder MLP ----
        for i in range(n_enc_layers):
            h = _linear(h, p_refs[2 * i], p_refs[2 * i + 1])
            if i < n_enc_layers - 1:
                h = jnp.maximum(h, NEG_SLOPE * h)  # LeakyReLU (mul + max)
            else:
                h = _sigmoid(h)                    # end activation
        z_ref[...] = h.astype(z_ref.dtype)

        # ---- decoder MLP ----
        off = 2 * n_enc_layers
        for i in range(n_dec_layers):
            h = _linear(h, p_refs[off + 2 * i], p_refs[off + 2 * i + 1])
            if i < n_dec_layers - 1:
                h = jnp.maximum(h, NEG_SLOPE * h)  # LeakyReLU
            else:
                h = _sigmoid(h)                    # end activation
        xrec_ref[...] = h.astype(xrec_ref.dtype)

    return kernel


# ----------------------------------------------------------------------------
# Parameter init (PyTorch nn.Linear default init)
# ----------------------------------------------------------------------------
def init_linear_params(key, neurons):
    """W ~ U(-1/sqrt(fan_in), 1/sqrt(fan_in)) with PyTorch (out, in) layout; b (out,)."""
    params = []
    for i in range(len(neurons) - 1):
        fan_in, fan_out = neurons[i], neurons[i + 1]
        key, kw, kb = jax.random.split(key, 3)
        bound = 1.0 / math.sqrt(fan_in)
        w = jax.random.uniform(kw, (fan_out, fan_in), jnp.float32, -bound, bound)
        b = jax.random.uniform(kb, (fan_out,), jnp.float32, -bound, bound)
        params += [w, b]
    return params, key


# ----------------------------------------------------------------------------
# Tiling heuristic
# ----------------------------------------------------------------------------
def _pick_tb(batch):
    """Batch-tile rows.

    Small batches: one block spanning the whole batch (block dim == array dim
    satisfies the (8,128) rule even for ragged sizes).  Large batches: big
    tiles (512..8192 rows, sublane-aligned) while keeping >= ~4 grid steps so
    v7x's two TensorCores each get >= 2 steps to shard and pipeline.
    """
    if batch <= 1024:
        return batch
    tb = max(512, min(8192, batch // 4))
    tb -= tb % 256
    return tb


# ----------------------------------------------------------------------------
# Pallas forward
# ----------------------------------------------------------------------------
@functools.partial(jax.jit, static_argnames=("n_enc_layers", "n_dec_layers"))
def _pallas_forward(x, flat_params, *, n_enc_layers, n_dec_layers):
    batch, n_features = x.shape
    zdim = flat_params[2 * n_enc_layers - 2].shape[0]  # last encoder W is (zdim, ewidths)

    TB = _pick_tb(batch)
    grid = (pl.cdiv(batch, TB),)

    # Kernel-side parameter layout: W pre-transposed to (in, out) in bf16 so the
    # kernel does a plain `h @ W`; biases reshaped to (1, out) in f32.  These are
    # KB-sized one-off ops, not batch-sized HBM passes.
    kparams = []
    for w, b in zip(flat_params[::2], flat_params[1::2]):
        kparams.append(w.T.astype(jnp.bfloat16))            # (in, out)
        kparams.append(b.reshape(1, -1).astype(jnp.float32))  # (1, out)

    # Weights/biases: full-array blocks with constant index_map -> DMA'd once,
    # VMEM-resident across all batch tiles.
    param_specs = [pl.BlockSpec(p.shape, lambda i: (0, 0)) for p in kparams]

    # Advisory cost estimate for XLA's scheduler.
    layer_dims = [(w.shape[1], w.shape[0]) for w in flat_params[::2]]
    flops = 2 * batch * sum(fi * fo for fi, fo in layer_dims)
    transcendentals = 2 * batch * (zdim + n_features)  # exp + recip per sigmoid output
    bytes_accessed = (4 * batch * (2 * n_features + zdim)
                      + sum(int(p.size) * p.dtype.itemsize for p in kparams))

    kernel = _make_ae_kernel(n_enc_layers, n_dec_layers)

    x_rec, z = pl.pallas_call(
        kernel,
        grid=grid,
        out_shape=(
            jax.ShapeDtypeStruct((batch, n_features), jnp.float32),
            jax.ShapeDtypeStruct((batch, zdim), jnp.float32),
        ),
        in_specs=[pl.BlockSpec((TB, n_features), lambda i: (i, 0))] + param_specs,
        out_specs=(
            pl.BlockSpec((TB, n_features), lambda i: (i, 0)),
            pl.BlockSpec((TB, zdim), lambda i: (i, 0)),
        ),
        compiler_params=pltpu.CompilerParams(
            dimension_semantics=("parallel",),  # megacore-shardable batch loop
        ),
        cost_estimate=pl.CostEstimate(
            flops=int(flops),
            transcendentals=int(transcendentals),
            bytes_accessed=int(bytes_accessed),
        ),
    )(x.astype(jnp.float32), *kparams)

    # MLP.forward ends with x.squeeze(1) (torch squeeze(1) is a no-op unless dim==1).
    if zdim == 1:
        z = z.reshape(batch)
    if n_features == 1:
        x_rec = x_rec.reshape(batch)
    return x_rec, z


# ----------------------------------------------------------------------------
# Plain-XLA path (used for tiny batches where grid/DMA overhead dominates)
# ----------------------------------------------------------------------------
@functools.partial(jax.jit, static_argnames=("n_enc_layers", "n_dec_layers"))
def _xla_forward(x, flat_params, *, n_enc_layers, n_dec_layers):
    batch, n_features = x.shape
    zdim = flat_params[2 * n_enc_layers - 2].shape[0]

    def mlp(h, off, n_layers):
        for i in range(n_layers):
            w, b = flat_params[off + 2 * i], flat_params[off + 2 * i + 1]
            h = h @ w.T + b.reshape(1, -1)
            h = jnp.where(h > 0, h, NEG_SLOPE * h) if i < n_layers - 1 else jax.nn.sigmoid(h)
        return h

    z = mlp(x.astype(jnp.float32), 0, n_enc_layers)
    x_rec = mlp(z, 2 * n_enc_layers, n_dec_layers)
    if zdim == 1:
        z = z.reshape(batch)
    if n_features == 1:
        x_rec = x_rec.reshape(batch)
    return x_rec, z


def autoencoder_forward(x, enc_params, dec_params, *, n_enc_layers, n_dec_layers,
                        force_pallas=False):
    flat = tuple(enc_params) + tuple(dec_params)
    if not force_pallas and x.shape[0] < 256:
        # Tiny batches: fixed kernel overhead dominates (worst on v5e) -> plain XLA.
        return _xla_forward(x, flat, n_enc_layers=n_enc_layers, n_dec_layers=n_dec_layers)
    return _pallas_forward(x, flat, n_enc_layers=n_enc_layers, n_dec_layers=n_dec_layers)


# ----------------------------------------------------------------------------
# Pure-JAX reference (optionally emulating the kernel's bf16 dot operands)
# ----------------------------------------------------------------------------
def reference_forward(x, enc_params, dec_params, n_enc_layers, n_dec_layers,
                      emulate_bf16=False):
    def maybe_bf16(a):
        return a.astype(jnp.bfloat16) if emulate_bf16 else a.astype(jnp.float32)

    def mlp(h, params, n_layers):
        for i in range(n_layers):
            w, b = params[2 * i], params[2 * i + 1]
            h = jnp.dot(maybe_bf16(h), maybe_bf16(w).T,
                        preferred_element_type=jnp.float32) + b.reshape(1, -1)
            h = jnp.where(h > 0, h, NEG_SLOPE * h) if i < n_layers - 1 else jax.nn.sigmoid(h)
        return h

    z = mlp(x.astype(jnp.float32), list(enc_params), n_enc_layers)
    x_rec = mlp(z, list(dec_params), n_dec_layers)
    return x_rec, z


if __name__ == "__main__":
    # args: n_features=16, edepth=2, ewidths=32, zdim=8,
    #       activ_ae='leakyrelu', e_activ_ae='sigmoid', xavier=False
    n_features, edepth, ewidths, zdim = 16, 2, 32, 8

    enc_neurons = [n_features] + edepth * [ewidths] + [zdim]
    dec_neurons = [zdim] + edepth * [ewidths] + [n_features]
    n_enc_layers = len(enc_neurons) - 1
    n_dec_layers = len(dec_neurons) - 1

    key = jax.random.PRNGKey(0)
    enc_params, key = init_linear_params(key, enc_neurons)
    dec_params, key = init_linear_params(key, dec_neurons)

    # batch=2 exercises the small/whole-batch block path; batch=4096 exercises
    # the multi-step (grid=4, TB=1024) pipelined path.
    for batch in (2, 4096):
        key, kx = jax.random.split(key)
        x = jax.random.normal(kx, (batch, n_features), jnp.float32)

        x_rec, z = autoencoder_forward(
            x, enc_params, dec_params,
            n_enc_layers=n_enc_layers, n_dec_layers=n_dec_layers,
            force_pallas=True,
        )
        jax.block_until_ready((x_rec, z))

        assert x_rec.shape == (batch, n_features) and z.shape == (batch, zdim)

        # Tight check vs a reference that emulates the kernel's bf16 dot operands.
        xr_bf, z_bf = reference_forward(x, enc_params, dec_params,
                                        n_enc_layers, n_dec_layers, emulate_bf16=True)
        assert jnp.allclose(z, z_bf, atol=1e-2), "z mismatch vs bf16-emulated reference"
        assert jnp.allclose(x_rec, xr_bf, atol=1e-2), "x_rec mismatch vs bf16-emulated reference"

        # Loose check vs the exact-f32 module semantics (bf16 operands => ~1e-2 band).
        xr_f32, z_f32 = reference_forward(x, enc_params, dec_params,
                                          n_enc_layers, n_dec_layers, emulate_bf16=False)
        assert jnp.allclose(z, z_f32, atol=5e-2), "z far from f32 reference"
        assert jnp.allclose(x_rec, xr_f32, atol=5e-2), "x_rec far from f32 reference"

    print("KERNEL_OK")
</pallas_src>

<mosaic_0001>
module attributes {stable_mosaic.version = 11 : i64} {
  func.func @kernel(%arg0: i32, %arg1: memref<2x16xf32, #tpu.memory_space<vmem>>, %arg2: memref<16x32xbf16, #tpu.memory_space<vmem>>, %arg3: memref<1x32xf32, #tpu.memory_space<vmem>>, %arg4: memref<32x32xbf16, #tpu.memory_space<vmem>>, %arg5: memref<1x32xf32, #tpu.memory_space<vmem>>, %arg6: memref<32x8xbf16, #tpu.memory_space<vmem>>, %arg7: memref<1x8xf32, #tpu.memory_space<vmem>>, %arg8: memref<8x32xbf16, #tpu.memory_space<vmem>>, %arg9: memref<1x32xf32, #tpu.memory_space<vmem>>, %arg10: memref<32x32xbf16, #tpu.memory_space<vmem>>, %arg11: memref<1x32xf32, #tpu.memory_space<vmem>>, %arg12: memref<32x16xbf16, #tpu.memory_space<vmem>>, %arg13: memref<1x16xf32, #tpu.memory_space<vmem>>, %arg14: memref<2x16xf32, #tpu.memory_space<vmem>>, %arg15: memref<2x8xf32, #tpu.memory_space<vmem>>) attributes {dimension_semantics = [#tpu.dimension_semantics<parallel>], iteration_bounds = array<i64: 1>, scalar_prefetch = 0 : i64, scratch_operands = 0 : i64, tpu.core_type = #tpu.core_type<tc>, window_params = [{transform_indices = @transform_0, window_bounds = array<i64: 2, 16>}, {pipeline_mode = #tpu.pipeline_mode<synchronous>, transform_indices = @transform_1, window_bounds = array<i64: 16, 32>}, {pipeline_mode = #tpu.pipeline_mode<synchronous>, transform_indices = @transform_2, window_bounds = array<i64: 1, 32>}, {pipeline_mode = #tpu.pipeline_mode<synchronous>, transform_indices = @transform_3, window_bounds = array<i64: 32, 32>}, {pipeline_mode = #tpu.pipeline_mode<synchronous>, transform_indices = @transform_4, window_bounds = array<i64: 1, 32>}, {pipeline_mode = #tpu.pipeline_mode<synchronous>, transform_indices = @transform_5, window_bounds = array<i64: 32, 8>}, {pipeline_mode = #tpu.pipeline_mode<synchronous>, transform_indices = @transform_6, window_bounds = array<i64: 1, 8>}, {pipeline_mode = #tpu.pipeline_mode<synchronous>, transform_indices = @transform_7, window_bounds = array<i64: 8, 32>}, {pipeline_mode = #tpu.pipeline_mode<synchronous>, transform_indices = @transform_8, window_bounds = array<i64: 1, 32>}, {pipeline_mode = #tpu.pipeline_mode<synchronous>, transform_indices = @transform_9, window_bounds = array<i64: 32, 32>}, {pipeline_mode = #tpu.pipeline_mode<synchronous>, transform_indices = @transform_10, window_bounds = array<i64: 1, 32>}, {pipeline_mode = #tpu.pipeline_mode<synchronous>, transform_indices = @transform_11, window_bounds = array<i64: 32, 16>}, {pipeline_mode = #tpu.pipeline_mode<synchronous>, transform_indices = @transform_12, window_bounds = array<i64: 1, 16>}, {transform_indices = @transform_13, window_bounds = array<i64: 2, 16>}, {transform_indices = @transform_14, window_bounds = array<i64: 2, 8>}]} {
    %c0 = arith.constant 0 : index
    %c0_0 = arith.constant 0 : index
    %0 = vector.load %arg1[%c0, %c0_0] : memref<2x16xf32, #tpu.memory_space<vmem>>, vector<2x16xf32>
    %1 = arith.truncf %0 : vector<2x16xf32> to vector<2x16xbf16>
    %c0_1 = arith.constant 0 : index
    %c0_2 = arith.constant 0 : index
    %2 = vector.load %arg2[%c0_1, %c0_2] : memref<16x32xbf16, #tpu.memory_space<vmem>>, vector<16x32xbf16>
    %cst = arith.constant dense<0.000000e+00> : vector<2x32xf32>
    %3 = tpu.matmul %1, %2, %cst {dimension_numbers = #tpu.dot_dimension_numbers<[1], [0], [0], [1], [0, 0, 1, 1], [], []>} : vector<2x16xbf16>, vector<16x32xbf16>, vector<2x32xf32> -> vector<2x32xf32>
    %c0_3 = arith.constant 0 : index
    %c0_4 = arith.constant 0 : index
    %4 = vector.load %arg3[%c0_3, %c0_4] : memref<1x32xf32, #tpu.memory_space<vmem>>, vector<1x32xf32>
    %5 = vector.broadcast %4 : vector<1x32xf32> to vector<2x32xf32>
    %6 = arith.addf %3, %5 : vector<2x32xf32>
    %cst_5 = arith.constant 0.00999999977 : f32
    %7 = vector.broadcast %cst_5 : f32 to vector<2x32xf32>
    %8 = arith.mulf %7, %6 : vector<2x32xf32>
    %9 = arith.maximumf %6, %8 : vector<2x32xf32>
    %10 = arith.truncf %9 : vector<2x32xf32> to vector<2x32xbf16>
    %c0_6 = arith.constant 0 : index
    %c0_7 = arith.constant 0 : index
    %11 = vector.load %arg4[%c0_6, %c0_7] : memref<32x32xbf16, #tpu.memory_space<vmem>>, vector<32x32xbf16>
    %cst_8 = arith.constant dense<0.000000e+00> : vector<2x32xf32>
    %12 = tpu.matmul %10, %11, %cst_8 {dimension_numbers = #tpu.dot_dimension_numbers<[1], [0], [0], [1], [0, 0, 1, 1], [], []>} : vector<2x32xbf16>, vector<32x32xbf16>, vector<2x32xf32> -> vector<2x32xf32>
    %c0_9 = arith.constant 0 : index
    %c0_10 = arith.constant 0 : index
    %13 = vector.load %arg5[%c0_9, %c0_10] : memref<1x32xf32, #tpu.memory_space<vmem>>, vector<1x32xf32>
    %14 = vector.broadcast %13 : vector<1x32xf32> to vector<2x32xf32>
    %15 = arith.addf %12, %14 : vector<2x32xf32>
    %cst_11 = arith.constant 0.00999999977 : f32
    %16 = vector.broadcast %cst_11 : f32 to vector<2x32xf32>
    %17 = arith.mulf %16, %15 : vector<2x32xf32>
    %18 = arith.maximumf %15, %17 : vector<2x32xf32>
    %19 = arith.truncf %18 : vector<2x32xf32> to vector<2x32xbf16>
    %c0_12 = arith.constant 0 : index
    %c0_13 = arith.constant 0 : index
    %20 = vector.load %arg6[%c0_12, %c0_13] : memref<32x8xbf16, #tpu.memory_space<vmem>>, vector<32x8xbf16>
    %cst_14 = arith.constant dense<0.000000e+00> : vector<2x8xf32>
    %21 = tpu.matmul %19, %20, %cst_14 {dimension_numbers = #tpu.dot_dimension_numbers<[1], [0], [0], [1], [0, 0, 1, 1], [], []>} : vector<2x32xbf16>, vector<32x8xbf16>, vector<2x8xf32> -> vector<2x8xf32>
    %c0_15 = arith.constant 0 : index
    %c0_16 = arith.constant 0 : index
    %22 = vector.load %arg7[%c0_15, %c0_16] : memref<1x8xf32, #tpu.memory_space<vmem>>, vector<1x8xf32>
    %23 = vector.broadcast %22 : vector<1x8xf32> to vector<2x8xf32>
    %24 = arith.addf %21, %23 : vector<2x8xf32>
    %cst_17 = arith.constant 0.000000e+00 : f32
    %25 = vector.broadcast %cst_17 : f32 to vector<2x8xf32>
    %26 = arith.subf %25, %24 : vector<2x8xf32>
    %27 = math.exp %26 : vector<2x8xf32>
    %cst_18 = arith.constant 1.000000e+00 : f32
    %28 = vector.broadcast %cst_18 : f32 to vector<2x8xf32>
    %29 = arith.addf %28, %27 : vector<2x8xf32>
    %30 = tpu.reciprocal %29 {approx = true} : vector<2x8xf32> -> vector<2x8xf32>
    %c0_19 = arith.constant 0 : index
    %c0_20 = arith.constant 0 : index
    %31 = vector.load %arg15[%c0_19, %c0_20] : memref<2x8xf32, #tpu.memory_space<vmem>>, vector<2x8xf32>
    tpu.vector_store %arg15[%c0_19, %c0_20], %30 {strides = array<i32>} : memref<2x8xf32, #tpu.memory_space<vmem>>, vector<2x8xf32>,
    %32 = arith.truncf %30 : vector<2x8xf32> to vector<2x8xbf16>
    %c0_21 = arith.constant 0 : index
    %c0_22 = arith.constant 0 : index
    %33 = vector.load %arg8[%c0_21, %c0_22] : memref<8x32xbf16, #tpu.memory_space<vmem>>, vector<8x32xbf16>
    %cst_23 = arith.constant dense<0.000000e+00> : vector<2x32xf32>
    %34 = tpu.matmul %32, %33, %cst_23 {dimension_numbers = #tpu.dot_dimension_numbers<[1], [0], [0], [1], [0, 0, 1, 1], [], []>} : vector<2x8xbf16>, vector<8x32xbf16>, vector<2x32xf32> -> vector<2x32xf32>
    %c0_24 = arith.constant 0 : index
    %c0_25 = arith.constant 0 : index
    %35 = vector.load %arg9[%c0_24, %c0_25] : memref<1x32xf32, #tpu.memory_space<vmem>>, vector<1x32xf32>
    %36 = vector.broadcast %35 : vector<1x32xf32> to vector<2x32xf32>
    %37 = arith.addf %34, %36 : vector<2x32xf32>
    %cst_26 = arith.constant 0.00999999977 : f32
    %38 = vector.broadcast %cst_26 : f32 to vector<2x32xf32>
    %39 = arith.mulf %38, %37 : vector<2x32xf32>
    %40 = arith.maximumf %37, %39 : vector<2x32xf32>
    %41 = arith.truncf %40 : vector<2x32xf32> to vector<2x32xbf16>
    %c0_27 = arith.constant 0 : index
    %c0_28 = arith.constant 0 : index
    %42 = vector.load %arg10[%c0_27, %c0_28] : memref<32x32xbf16, #tpu.memory_space<vmem>>, vector<32x32xbf16>
    %cst_29 = arith.constant dense<0.000000e+00> : vector<2x32xf32>
    %43 = tpu.matmul %41, %42, %cst_29 {dimension_numbers = #tpu.dot_dimension_numbers<[1], [0], [0], [1], [0, 0, 1, 1], [], []>} : vector<2x32xbf16>, vector<32x32xbf16>, vector<2x32xf32> -> vector<2x32xf32>
    %c0_30 = arith.constant 0 : index
    %c0_31 = arith.constant 0 : index
    %44 = vector.load %arg11[%c0_30, %c0_31] : memref<1x32xf32, #tpu.memory_space<vmem>>, vector<1x32xf32>
    %45 = vector.broadcast %44 : vector<1x32xf32> to vector<2x32xf32>
    %46 = arith.addf %43, %45 : vector<2x32xf32>
    %cst_32 = arith.constant 0.00999999977 : f32
    %47 = vector.broadcast %cst_32 : f32 to vector<2x32xf32>
    %48 = arith.mulf %47, %46 : vector<2x32xf32>
    %49 = arith.maximumf %46, %48 : vector<2x32xf32>
    %50 = arith.truncf %49 : vector<2x32xf32> to vector<2x32xbf16>
    %c0_33 = arith.constant 0 : index
    %c0_34 = arith.constant 0 : index
    %51 = vector.load %arg12[%c0_33, %c0_34] : memref<32x16xbf16, #tpu.memory_space<vmem>>, vector<32x16xbf16>
    %cst_35 = arith.constant dense<0.000000e+00> : vector<2x16xf32>
    %52 = tpu.matmul %50, %51, %cst_35 {dimension_numbers = #tpu.dot_dimension_numbers<[1], [0], [0], [1], [0, 0, 1, 1], [], []>} : vector<2x32xbf16>, vector<32x16xbf16>, vector<2x16xf32> -> vector<2x16xf32>
    %c0_36 = arith.constant 0 : index
    %c0_37 = arith.constant 0 : index
    %53 = vector.load %arg13[%c0_36, %c0_37] : memref<1x16xf32, #tpu.memory_space<vmem>>, vector<1x16xf32>
    %54 = vector.broadcast %53 : vector<1x16xf32> to vector<2x16xf32>
    %55 = arith.addf %52, %54 : vector<2x16xf32>
    %cst_38 = arith.constant 0.000000e+00 : f32
    %56 = vector.broadcast %cst_38 : f32 to vector<2x16xf32>
    %57 = arith.subf %56, %55 : vector<2x16xf32>
    %58 = math.exp %57 : vector<2x16xf32>
    %cst_39 = arith.constant 1.000000e+00 : f32
    %59 = vector.broadcast %cst_39 : f32 to vector<2x16xf32>
    %60 = arith.addf %59, %58 : vector<2x16xf32>
    %61 = tpu.reciprocal %60 {approx = true} : vector<2x16xf32> -> vector<2x16xf32>
    %c0_40 = arith.constant 0 : index
    %c0_41 = arith.constant 0 : index
    %62 = vector.load %arg14[%c0_40, %c0_41] : memref<2x16xf32, #tpu.memory_space<vmem>>, vector<2x16xf32>
    tpu.vector_store %arg14[%c0_40, %c0_41], %61 {strides = array<i32>} : memref<2x16xf32, #tpu.memory_space<vmem>>, vector<2x16xf32>,
    return
  }
  func.func @transform_0(%arg0: i32) -> (i32, i32) {
    %c0_i32 = arith.constant 0 : i32
    %c0_i32_0 = arith.constant 0 : i32
    return %arg0, %c0_i32 : i32, i32
  }
  func.func @transform_1(%arg0: i32) -> (i32, i32) {
    %c0_i32 = arith.constant 0 : i32
    %c0_i32_0 = arith.constant 0 : i32
    %c0_i32_1 = arith.constant 0 : i32
    return %c0_i32, %c0_i32_0 : i32, i32
  }
  func.func @transform_2(%arg0: i32) -> (i32, i32) {
    %c0_i32 = arith.constant 0 : i32
    %c0_i32_0 = arith.constant 0 : i32
    %c0_i32_1 = arith.constant 0 : i32
    return %c0_i32, %c0_i32_0 : i32, i32
  }
  func.func @transform_3(%arg0: i32) -> (i32, i32) {
    %c0_i32 = arith.constant 0 : i32
    %c0_i32_0 = arith.constant 0 : i32
    %c0_i32_1 = arith.constant 0 : i32
    return %c0_i32, %c0_i32_0 : i32, i32
  }
  func.func @transform_4(%arg0: i32) -> (i32, i32) {
    %c0_i32 = arith.constant 0 : i32
    %c0_i32_0 = arith.constant 0 : i32
    %c0_i32_1 = arith.constant 0 : i32
    return %c0_i32, %c0_i32_0 : i32, i32
  }
  func.func @transform_5(%arg0: i32) -> (i32, i32) {
    %c0_i32 = arith.constant 0 : i32
    %c0_i32_0 = arith.constant 0 : i32
    %c0_i32_1 = arith.constant 0 : i32
    return %c0_i32, %c0_i32_0 : i32, i32
  }
  func.func @transform_6(%arg0: i32) -> (i32, i32) {
    %c0_i32 = arith.constant 0 : i32
    %c0_i32_0 = arith.constant 0 : i32
    %c0_i32_1 = arith.constant 0 : i32
    return %c0_i32, %c0_i32_0 : i32, i32
  }
  func.func @transform_7(%arg0: i32) -> (i32, i32) {
    %c0_i32 = arith.constant 0 : i32
    %c0_i32_0 = arith.constant 0 : i32
    %c0_i32_1 = arith.constant 0 : i32
    return %c0_i32, %c0_i32_0 : i32, i32
  }
  func.func @transform_8(%arg0: i32) -> (i32, i32) {
    %c0_i32 = arith.constant 0 : i32
    %c0_i32_0 = arith.constant 0 : i32
    %c0_i32_1 = arith.constant 0 : i32
    return %c0_i32, %c0_i32_0 : i32, i32
  }
  func.func @transform_9(%arg0: i32) -> (i32, i32) {
    %c0_i32 = arith.constant 0 : i32
    %c0_i32_0 = arith.constant 0 : i32
    %c0_i32_1 = arith.constant 0 : i32
    return %c0_i32, %c0_i32_0 : i32, i32
  }
  func.func @transform_10(%arg0: i32) -> (i32, i32) {
    %c0_i32 = arith.constant 0 : i32
    %c0_i32_0 = arith.constant 0 : i32
    %c0_i32_1 = arith.constant 0 : i32
    return %c0_i32, %c0_i32_0 : i32, i32
  }
  func.func @transform_11(%arg0: i32) -> (i32, i32) {
    %c0_i32 = arith.constant 0 : i32
    %c0_i32_0 = arith.constant 0 : i32
    %c0_i32_1 = arith.constant 0 : i32
    return %c0_i32, %c0_i32_0 : i32, i32
  }
  func.func @transform_12(%arg0: i32) -> (i32, i32) {
    %c0_i32 = arith.constant 0 : i32
    %c0_i32_0 = arith.constant 0 : i32
    %c0_i32_1 = arith.constant 0 : i32
    return %c0_i32, %c0_i32_0 : i32, i32
  }
  func.func @transform_13(%arg0: i32) -> (i32, i32) {
    %c0_i32 = arith.constant 0 : i32
    %c0_i32_0 = arith.constant 0 : i32
    return %arg0, %c0_i32 : i32, i32
  }
  func.func @transform_14(%arg0: i32) -> (i32, i32) {
    %c0_i32 = arith.constant 0 : i32
    %c0_i32_0 = arith.constant 0 : i32
    return %arg0, %c0_i32 : i32, i32
  }
}

</mosaic_0001>

<bundles_post_ra>
// kernel: _pallas_forward.1
= control target key start
LH: loop header
LB: loop body
LE: loop exit
PB: predicated region body
PF: predicated region fallthrough
CT: control target
= control target key end

     0   :  { %20 = vsyncpa [#allocation3], 0  ;;  %vm63_vm0 = vcmask 130048   ;;  %s567_s0 = inlined_call_operand.vmem [shape: f32[2,16], index: 0, kind: input, shape index: {}]   ;;  %s568_s1 = inlined_call_operand.vmem [shape: bf16[16,32], index: 1, kind: input, shape index: {}]   ;;  %s569_s2 = inlined_call_operand.vmem [shape: f32[1,32], index: 2, kind: input, shape index: {}]   ;;  %s570_s3 = inlined_call_operand.vmem [shape: bf16[32,32], index: 3, kind: input, shape index: {}]   ;;  %s571_s4 = inlined_call_operand.vmem [shape: f32[1,32], index: 4, kind: input, shape index: {}]   ;;  %s572_s5 = inlined_call_operand.vmem [shape: bf16[32,8], index: 5, kind: input, shape index: {}]   ;;  %s573_s6 = inlined_call_operand.vmem [shape: f32[1,8], index: 6, kind: input, shape index: {}]   ;;  %s574_s7 = inlined_call_operand.vmem [shape: bf16[8,32], index: 7, kind: input, shape index: {}]   ;;  %s575_s8 = inlined_call_operand.vmem [shape: f32[1,32], index: 8, kind: input, shape index: {}]   ;;  %s576_s9 = inlined_call_operand.vmem [shape: bf16[32,32], index: 9, kind: input, shape index: {}]   ;;  %s577_s10 = inlined_call_operand.vmem [shape: f32[1,32], index: 10, kind: input, shape index: {}]   ;;  %s578_s11 = inlined_call_operand.vmem [shape: bf16[32,16], index: 11, kind: input, shape index: {}]   ;;  %s579_s12 = inlined_call_operand.vmem [shape: f32[1,16], index: 12, kind: input, shape index: {}]   ;;  %s580_s13 = inlined_call_operand.hbm [shape: f32[2,16], index: 13, kind: output, shape index: {0}]   ;;  %s581_s14 = inlined_call_operand.hbm [shape: f32[2,8], index: 14, kind: output, shape index: {1}]  }
   0x1   :  { %v352_v0 = vld [vmem:[%s568_s1] sm:$0xff] }
   0x2   :  { %v49_v1 = vld [vmem:[%s567_s0] sm:$0x3]  ;;  %74 = vmatpush.bf16.msra.mxu0 %v352_v0 }
   0x3   :  { %v50_v2 = vpack.c.bf16 %v49_v1, %v49_v1 }
   0x4   :  { %21 = vsyncpa [#allocation5], 0  ;;  %v354_v3 = vld [vmem:[%s570_s3 + $0x8] sm:$0xff]  ;;  %v353_v4 = vld [vmem:[%s570_s3] sm:$0xff]  ;;  %vm103_vm1 = vcmask 261120   ;;  %vm176_vm2 = vcmask 1043456  }
   0x5   :  { %314 = vmatmul.msk.bf16.vlgmr.msra.gmra.mxu0 %vm63_vm0, %v50_v2  ;;  %113 = vmatpush.bf16.msra.mxu1 %v354_v3  ;;  %v363_v5 = vld [vmem:[%s569_s2] ss:$0 sm:$0xff]  ;;  %v356_v12 = vld [vmem:[%s572_s5 + $0x8] sm:$0xff]  ;;  %vm164_vm3 = vcmask 58368   ;;  %vm172_vm4 = vcmask 64512   ;;  %s296_s0 = sshll.u32 %s581_s14, 4  ;;  %s297_s0 = int_to_ptr.hbm [resolvable:$true] %s296_s0 }
   0x6   :  { %152 = vmatpush.bf16.msra.mxu2 %v356_v12  ;;  %v355_v13 = vld [vmem:[%s572_s5] sm:$0xff]  ;;  %v358_v23 = vld [vmem:[%s576_s9 + $0x8] sm:$0xff]  ;;  %s285_s2 = sshll.u32 %s580_s13, 4  ;;  %vm276_vm5 = vcmask 123904   ;;  %s286_s2 = int_to_ptr.hbm [resolvable:$true] %s285_s2 }
   0x7   :  { %v364_v14 = vld [vmem:[%s571_s4] ss:$0 sm:$0xff]  ;;  %225 = vmatpush.bf16.msrb.mxu0 %v358_v23  ;;  %v360_v35 = vld [vmem:[%s578_s11 + $0x8] sm:$0xff] }
   0x8   :  { %v167_v21 = vld [vmem:[%s574_s7] sm:$0xf] }
   0x9   :  { %114 = vmatpush.bf16.msra.mxu1 %v353_v4  ;;  %v178_v22 = vsel %vm176_vm2, %v167_v21, 0  ;;  %v365_v24 = vld [vmem:[%s573_s6] ss:$0 sm:$0xff] }
   0xa   :  { %153 = vmatpush.bf16.msra.mxu2 %v355_v13  ;;  %187 = vmatpush.bf16.msra.mxu3 %v178_v22  ;;  %v357_v34 = vld [vmem:[%s576_s9] sm:$0xff] }
   0xb   :  { %226 = vmatpush.bf16.msrb.mxu0 %v357_v34  ;;  %v366_v36 = vld [vmem:[%s575_s8] ss:$0 sm:$0xff]  ;;  %s429_s8 = smov [#allocation4]  }
   0xc   :  { %v359_v43 = vld [vmem:[%s578_s11] sm:$0xff]  ;;  %s294_s20 = sshll.u32 %s429_s8, 4  ;;  %s295_s20 = int_to_ptr.vmem [resolvable:$true] %s294_s20 }
   0xd   :  { %v367_v44 = vld [vmem:[%s577_s10] ss:$0 sm:$0xff]  ;;  %s430_s10 = smov [#allocation2]  }
   0xe   :  { %264 = vmatpush.bf16.msrb.mxu3 %v360_v35  ;;  %v368_v51 = vld [vmem:[%s579_s12] ss:$0 sm:$0xff]  ;;  %s283_s3 = sshll.u32 %s430_s10, 4  ;;  %s284_s3 = int_to_ptr.vmem [resolvable:$true] %s283_s3 }
  0x12   :  { %265 = vmatpush.bf16.msrb.mxu3 %v359_v43 }
  0x82   :  { %v76_v6 = vpop.f32.mrf.mxu0 }
  0x83   :  { %v77_v7 = vadd.f32 %v363_v5, %v76_v6 }
  0x85   :  { %v80_v8 = vmul.f32 0.01, %v77_v7 }
  0x87   :  { %v81_v9 = vmax.f32 %v77_v7, %v80_v8 }
  0x89   :  { %v82_v10 = vpack.c.bf16 %v81_v9, %v81_v9 }
  0x8a   :  { %v78_v11 = vpop.f32.mrf.mxu0 }
  0x8b   :  { %323 = vmatmul.msk.bf16.vlgmr.msra.gmra.mxu1 %vm103_vm1, %v82_v10 }
 0x108   :  { %v116_v15 = vpop.f32.mrf.mxu1 }
 0x109   :  { %v117_v16 = vadd.f32 %v364_v14, %v116_v15 }
 0x10b   :  { %v120_v17 = vmul.f32 0.01, %v117_v16 }
 0x10d   :  { %v121_v18 = vmax.f32 %v117_v16, %v120_v17 }
 0x10f   :  { %v122_v19 = vpack.c.bf16 %v121_v18, %v121_v18 }
 0x110   :  { %v118_v20 = vpop.f32.mrf.mxu1 }
 0x111   :  { %332 = vmatmul.msk.bf16.vlgmr.msra.gmra.mxu2 %vm103_vm1, %v122_v19 }
 0x194   :  { %v155_v25 = vpop.f32.mrf.mxu2 }
 0x195   :  { %v156_v26 = vadd.f32 %v365_v24, %v155_v25 }
 0x197   :  { %v159_v27 = vsub.f32 0.0, %v156_v26 }
 0x199   :  { %v160_v28 = vmul.f32 1.442695, %v159_v27 }
 0x19b   :  { %369 = vpow2.f32 %v160_v28 }
 0x19c   :  { %v157_v29 = vpop.f32.mrf.mxu2 }
 0x1a1   :  { %v370_v30 = vpop.eup %369 }
 0x1a2   :  { %v162_v31 = vadd.f32 1.0, %v370_v30 }
 0x1a4   :  { %371 = vrcp.f32 %v162_v31 }
 0x1aa   :  { %v372_v32 = vpop.eup %371 }
 0x1ab   :  { %v166_v33 = vpack.c.bf16 %v372_v32, %v372_v32  ;;  %165 = vst.msk [vmem:[#allocation4] sm:$0x3] %vm164_vm3, %v372_v32 }
 0x1ac   :  { %299 = dma.vmem_to_hbm [thread:$0]  %s295_s20, 32, %s297_s0, [#allocation5]  }
 0x1ad   :  { %333 = vmatmul.msk.bf16.vlgmr.msra.gmra.mxu3 %vm172_vm4, %v166_v33 }
 0x230   :  { %v189_v37 = vpop.f32.mrf.mxu3 }
 0x231   :  { %v190_v38 = vadd.f32 %v366_v36, %v189_v37 }
 0x233   :  { %v193_v39 = vmul.f32 0.01, %v190_v38 }
 0x235   :  { %v194_v40 = vmax.f32 %v190_v38, %v193_v39 }
 0x237   :  { %v195_v41 = vpack.c.bf16 %v194_v40, %v194_v40 }
 0x238   :  { %v191_v42 = vpop.f32.mrf.mxu3 }
 0x239   :  { %342 = vmatmul.msk.bf16.vlgmr.msrb.gmra.mxu0 %vm103_vm1, %v195_v41 }
 0x2b6   :  { %v228_v45 = vpop.f32.mrf.mxu0 }
 0x2b7   :  { %v229_v46 = vadd.f32 %v367_v44, %v228_v45 }
 0x2b9   :  { %v232_v47 = vmul.f32 0.01, %v229_v46 }
 0x2bb   :  { %v233_v48 = vmax.f32 %v229_v46, %v232_v47 }
 0x2bd   :  { %v234_v49 = vpack.c.bf16 %v233_v48, %v233_v48 }
 0x2be   :  { %v230_v50 = vpop.f32.mrf.mxu0 }
 0x2bf   :  { %351 = vmatmul.msk.bf16.vlgmr.msrb.gmra.mxu3 %vm103_vm1, %v234_v49 }
 0x342   :  { %v267_v52 = vpop.f32.mrf.mxu3 }
 0x343   :  { %v268_v53 = vadd.f32 %v368_v51, %v267_v52 }
 0x345   :  { %v271_v54 = vsub.f32 0.0, %v268_v53 }
 0x347   :  { %v272_v55 = vmul.f32 1.442695, %v271_v54 }
 0x349   :  { %373 = vpow2.f32 %v272_v55 }
 0x34a   :  { %v269_v56 = vpop.f32.mrf.mxu3 }
 0x34f   :  { %v374_v57 = vpop.eup %373 }
 0x350   :  { %v274_v58 = vadd.f32 1.0, %v374_v57 }
 0x352   :  { %375 = vrcp.f32 %v274_v58 }
 0x358   :  { %v376_v59 = vpop.eup %375 }
 0x359   :  { %277 = vst.msk [vmem:[#allocation2] sm:$0x3] %vm276_vm5, %v376_v59 }
 0x35a   :  { %288 = dma.vmem_to_hbm [thread:$0]  %s284_s3, 32, %s286_s2, [#allocation3]  }
 0x35b   :  { %425 = dma.done.wait [#allocation3], 32  }
 0x35c   :  { %426 = vsyncadd [#allocation3], 4294967264 }
 0x35d   :  { %427 = dma.done.wait [#allocation5], 32  }
 0x35e   :  { %428 = vsyncadd [#allocation5], 4294967264 }
 0x35f   :  { %308 = vsyncpa [#allocation3], 1 }
 0x360   :  { %309 = vsyncpa [#allocation5], 1 }

</bundles_post_ra>
